<compile_context>
chip_gen: v5e
topology: v5e:2x2
jax: 0.10.0
libtpu: 0.0.40
codegen_flags: <defaults>
</compile_context>

<pallas_src>
import jax
import jax.numpy as jnp
from jax.experimental import pallas as pl
from jax.experimental.pallas import tpu as pltpu

_MAX_BATCH_TILE = 4096  # batch rows per grid step (safe within v5e's 16 MiB scoped VMEM)


def _linear_kernel(x_ref, w_ref, b_ref, o_ref):
    # x_ref: (TB, 1), w_ref: (1, OUT), b_ref: (1, OUT), o_ref: (TB, OUT)
    # Pure VPU: broadcast (TB,1)*(1,OUT) outer product fused with the bias add.
    o_ref[...] = x_ref[...] * w_ref[...] + b_ref[...]


def prepare_params(weight, bias):
    """One-time parameter layout prep (hoisted out of the forward path).

    Args:
      weight: (out_features, in_features=1) — PyTorch nn.Linear convention.
      bias:   (out_features,)
    Returns:
      w_row: (1, out_features), b_row: (1, out_features)
    """
    out_f = weight.shape[0]
    w_row = weight.reshape(out_f, 1).T          # (1, out_f) == W^T for in_features=1
    b_row = bias.reshape(1, out_f)
    return w_row, b_row


def gen_forward(x, w_row, b_row):
    """Pallas equivalent of nn.Linear(1, 10) forward.

    Args:
      x:     (B, 1)
      w_row: (1, 10)  precomputed via prepare_params
      b_row: (1, 10)
    Returns:
      (B, 10)
    """
    B, in_f = x.shape
    out_f = w_row.shape[1]
    out_dtype = jnp.result_type(x.dtype, w_row.dtype, b_row.dtype)

    tb = B if B <= _MAX_BATCH_TILE else _MAX_BATCH_TILE
    grid = (pl.cdiv(B, tb),)

    return pl.pallas_call(
        _linear_kernel,
        out_shape=jax.ShapeDtypeStruct((B, out_f), out_dtype),
        grid=grid,
        in_specs=[
            pl.BlockSpec((tb, in_f), lambda i: (i, 0)),    # x tile, streamed over batch
            pl.BlockSpec((1, out_f), lambda i: (0, 0)),    # weight row, resident in VMEM
            pl.BlockSpec((1, out_f), lambda i: (0, 0)),    # bias row, resident in VMEM
        ],
        out_specs=pl.BlockSpec((tb, out_f), lambda i: (i, 0)),
        compiler_params=pltpu.CompilerParams(
            dimension_semantics=("parallel",),             # dual-TC split on v7x
        ),
    )(x, w_row, b_row)


if __name__ == "__main__":
    key = jax.random.PRNGKey(0)
    kx, kw, kb = jax.random.split(key, 3)

    B = 8
    in_features, out_features = 1, 10

    # Deterministic parameter init (mimicking nn.Linear's uniform fan-in init).
    bound = 1.0 / (in_features ** 0.5)
    weight = jax.random.uniform(kw, (out_features, in_features),
                                minval=-bound, maxval=bound, dtype=jnp.float32)
    bias = jax.random.uniform(kb, (out_features,),
                              minval=-bound, maxval=bound, dtype=jnp.float32)

    x = jax.random.normal(kx, (B, in_features), dtype=jnp.float32)

    # Parameter layout prep happens once, outside the forward path.
    w_row, b_row = prepare_params(weight, bias)

    y = gen_forward(x, w_row, b_row)
    y = jax.block_until_ready(y)

    # Reference check against plain JAX.
    y_ref = x @ weight.T + bias
    assert y.shape == (B, out_features)
    assert jnp.allclose(y, y_ref, atol=1e-5, rtol=1e-5)

    print("KERNEL_OK")
</pallas_src>

<mosaic_0001>
module attributes {stable_mosaic.version = 11 : i64} {
  func.func @_linear_kernel(%arg0: i32, %arg1: memref<8x1xf32, #tpu.memory_space<vmem>>, %arg2: memref<1x10xf32, #tpu.memory_space<vmem>>, %arg3: memref<1x10xf32, #tpu.memory_space<vmem>>, %arg4: memref<8x10xf32, #tpu.memory_space<vmem>>) attributes {dimension_semantics = [#tpu.dimension_semantics<parallel>], iteration_bounds = array<i64: 1>, scalar_prefetch = 0 : i64, scratch_operands = 0 : i64, tpu.core_type = #tpu.core_type<tc>, window_params = [{transform_indices = @transform_0, window_bounds = array<i64: 8, 1>}, {pipeline_mode = #tpu.pipeline_mode<synchronous>, transform_indices = @transform_1, window_bounds = array<i64: 1, 10>}, {pipeline_mode = #tpu.pipeline_mode<synchronous>, transform_indices = @transform_2, window_bounds = array<i64: 1, 10>}, {transform_indices = @transform_3, window_bounds = array<i64: 8, 10>}]} {
    %c0 = arith.constant 0 : index
    %c0_0 = arith.constant 0 : index
    %0 = vector.load %arg1[%c0, %c0_0] : memref<8x1xf32, #tpu.memory_space<vmem>>, vector<8x1xf32>
    %c0_1 = arith.constant 0 : index
    %c0_2 = arith.constant 0 : index
    %1 = vector.load %arg2[%c0_1, %c0_2] : memref<1x10xf32, #tpu.memory_space<vmem>>, vector<1x10xf32>
    %2 = vector.broadcast %0 : vector<8x1xf32> to vector<8x10xf32>
    %3 = vector.broadcast %1 : vector<1x10xf32> to vector<8x10xf32>
    %4 = arith.mulf %2, %3 : vector<8x10xf32>
    %c0_3 = arith.constant 0 : index
    %c0_4 = arith.constant 0 : index
    %5 = vector.load %arg3[%c0_3, %c0_4] : memref<1x10xf32, #tpu.memory_space<vmem>>, vector<1x10xf32>
    %6 = vector.broadcast %5 : vector<1x10xf32> to vector<8x10xf32>
    %7 = arith.addf %4, %6 : vector<8x10xf32>
    %c0_5 = arith.constant 0 : index
    %c0_6 = arith.constant 0 : index
    %8 = vector.load %arg4[%c0_5, %c0_6] : memref<8x10xf32, #tpu.memory_space<vmem>>, vector<8x10xf32>
    tpu.vector_store %arg4[%c0_5, %c0_6], %7 {strides = array<i32>} : memref<8x10xf32, #tpu.memory_space<vmem>>, vector<8x10xf32>,
    return
  }
  func.func @transform_0(%arg0: i32) -> (i32, i32) {
    %c0_i32 = arith.constant 0 : i32
    %c0_i32_0 = arith.constant 0 : i32
    return %arg0, %c0_i32 : i32, i32
  }
  func.func @transform_1(%arg0: i32) -> (i32, i32) {
    %c0_i32 = arith.constant 0 : i32
    %c0_i32_0 = arith.constant 0 : i32
    %c0_i32_1 = arith.constant 0 : i32
    return %c0_i32, %c0_i32_0 : i32, i32
  }
  func.func @transform_2(%arg0: i32) -> (i32, i32) {
    %c0_i32 = arith.constant 0 : i32
    %c0_i32_0 = arith.constant 0 : i32
    %c0_i32_1 = arith.constant 0 : i32
    return %c0_i32, %c0_i32_0 : i32, i32
  }
  func.func @transform_3(%arg0: i32) -> (i32, i32) {
    %c0_i32 = arith.constant 0 : i32
    %c0_i32_0 = arith.constant 0 : i32
    return %arg0, %c0_i32 : i32, i32
  }
}

</mosaic_0001>

<bundles_post_ra>
// kernel: tpu_custom_call.1
= control target key start
LH: loop header
LB: loop body
LE: loop exit
PB: predicated region body
PF: predicated region fallthrough
CT: control target
= control target key end

     0   :  { %v80_v1 = vmov 0   ;;  %s114_s0 = inlined_call_operand.vmem [shape: f32[8,1], index: 0, kind: input, shape index: {}]   ;;  %s115_s1 = inlined_call_operand.vmem [shape: f32[1,10], index: 1, kind: input, shape index: {}]   ;;  %s116_s2 = inlined_call_operand.vmem [shape: f32[1,10], index: 2, kind: input, shape index: {}]   ;;  %s117_s3 = inlined_call_operand.hbm [shape: f32[8,10], index: 3, kind: output, shape index: {}]  }
   0x1   :  { %v15_v0 = vld [vmem:[%s114_s0] sm:$0xff]  ;;  %51 = vset.pattern.permute.xlu0 %v80_v1 }
   0x2   :  { %8 = vsyncpa [#allocation3], 0  ;;  %19 = vperm.xlu0 %51, %v15_v0   ;;  %v52_v2 = vld [vmem:[%s115_s1] ss:$0 sm:$0xff]  ;;  %s81_s18 = smov [#allocation2]   ;;  %s40_s22 = sshll.u32 %s117_s3, 4  ;;  %s41_s22 = int_to_ptr.hbm [resolvable:$true] %s40_s22 }
   0x3   :  { %v53_v3 = vld [vmem:[%s116_s2] ss:$0 sm:$0xff]  ;;  %s38_s19 = sshll.u32 %s81_s18, 4  ;;  %vm31_vm0 = vcmask 80896   ;;  %s39_s19 = int_to_ptr.vmem [resolvable:$true] %s38_s19 }
  0x74   :  { %v20_v4 = vpop.permute.xlu0 %19 }
  0x75   :  { %v25_v5 = vmul.f32 %v52_v2, %v20_v4 }
  0x77   :  { %v30_v6 = vadd.f32 %v53_v3, %v25_v5 }
  0x79   :  { %32 = vst.msk [vmem:[#allocation2] sm:$0xff] %vm31_vm0, %v30_v6 }
  0x7a   :  { %43 = dma.vmem_to_hbm [thread:$0]  %s39_s19, 128, %s41_s22, [#allocation3]  }
  0x7b   :  { %78 = dma.done.wait [#allocation3], 128  }
  0x7c   :  { %79 = vsyncadd [#allocation3], 4294967168 }
  0x7d   :  { %48 = vsyncpa [#allocation3], 1 }

</bundles_post_ra>
